<compile_context>
chip_gen: v5e
topology: v5e:2x2
jax: 0.10.0
libtpu: 0.0.40
codegen_flags: <defaults>
</compile_context>

<pallas_src>
import functools

import numpy as np
import jax
import jax.numpy as jnp
from jax.experimental import pallas as pl
from jax.experimental.pallas import tpu as pltpu


# --------------------------------------------------------------------------
# Host-side: 1-D linear-interp matrix (align_corners=True), static.
# --------------------------------------------------------------------------
def _interp_matrix(out_size: int, in_size: int) -> np.ndarray:
    R = np.zeros((out_size, in_size), dtype=np.float32)
    if out_size == 1 or in_size == 1:
        R[:, 0] = 1.0
        return R
    scale = (in_size - 1) / (out_size - 1)
    for i in range(out_size):
        s = i * scale
        i0 = min(int(np.floor(s)), in_size - 1)
        i1 = min(i0 + 1, in_size - 1)
        w1 = s - i0
        R[i, i0] += 1.0 - w1
        R[i, i1] += w1
    return R


# --------------------------------------------------------------------------
# Fused kernel: upsample -> MXU pooling -> fused reg/cls heads.
# --------------------------------------------------------------------------
def _fused_kernel(rkt_ref, hm_ref, feat_ref, hp_ref, out_ref, *,
                  C, HW, DCOL, reg_dim, cls_dim):
    f32 = jnp.float32
    C2 = 2 * C
    tb = hm_ref.shape[0]
    out_cols = out_ref.shape[-1]
    eps = 1e-5

    # --- bilinear upsample (+ denominator column) : one (tb,hw)x(hw,UPC) matmul
    hm = hm_ref[...].astype(f32)                                      # (tb, hw)
    upd = jnp.dot(hm, rkt_ref[...], preferred_element_type=f32)       # (tb, UPC)
    up = upd[:, :HW]                                                  # (tb, HW) upsampled hm
    denom = upd[:, DCOL:DCOL + 1]                                     # (tb, 1) == sum_HW(up)

    # --- sigmoid-weighted + global pooling as ONE batched MXU contraction ----
    feat = feat_ref[...]                                              # (tb, C, HW)
    sig = jax.nn.sigmoid(up)                                          # (tb, HW)
    k_idx = jax.lax.broadcasted_iota(jnp.int32, (tb, 2, HW), 1)
    pool_w = jnp.where(k_idx == 0, sig[:, None, :], 1.0 / HW)         # [sig | mean] weights
    pooled = jnp.einsum('tkn,tcn->tkc', pool_w.astype(feat.dtype), feat,
                        preferred_element_type=f32)                   # (tb, 2, C)

    x_raw = pooled.reshape(tb, C2)                                    # [sig-weighted | mean]
    col = jax.lax.broadcasted_iota(jnp.int32, (tb, C2), 1)
    first_half = col < C
    x = jnp.where(first_half, x_raw * (1.0 / denom), x_raw)           # exact div (torch parity)

    # --- fused heads: LN1 (affine folded into W1 on host) -> Linear1 ----------
    mu1 = jnp.mean(x, axis=-1, keepdims=True)
    var1 = jnp.mean((x - mu1) ** 2, axis=-1, keepdims=True)
    xn = (x - mu1) * jax.lax.rsqrt(var1 + eps)

    w1 = hp_ref[0:C2, 0:C2]                                           # (2C, 2C)
    c1 = hp_ref[2 * C2 + 0:2 * C2 + 1, 0:C2]                          # (1, 2C)
    h1 = jnp.dot(xn, w1, preferred_element_type=f32) + c1             # (tb, 2C)

    # --- per-head LN2 on the two halves (masked, no concat/relayout) + ReLU ---
    g2 = hp_ref[2 * C2 + 2:2 * C2 + 3, 0:C2]                          # (1, 2C)
    b2 = hp_ref[2 * C2 + 3:2 * C2 + 4, 0:C2]                          # (1, 2C)
    inv_c = 1.0 / C
    mean_r = jnp.sum(jnp.where(first_half, h1, 0.0), -1, keepdims=True) * inv_c
    mean_c = jnp.sum(jnp.where(first_half, 0.0, h1), -1, keepdims=True) * inv_c
    mu2 = jnp.where(first_half, mean_r, mean_c)
    d = h1 - mu2
    var_r = jnp.sum(jnp.where(first_half, d * d, 0.0), -1, keepdims=True) * inv_c
    var_c = jnp.sum(jnp.where(first_half, 0.0, d * d), -1, keepdims=True) * inv_c
    var2 = jnp.where(first_half, var_r, var_c)
    h1n = d * jax.lax.rsqrt(var2 + eps) * g2 + b2
    h1n = jnp.maximum(h1n, 0.0)                                       # ReLU
    # TODO(synk): nn.Dropout treated as identity (inference-mode forward).

    # --- Linear2 (both heads in one matmul) + masked sigmoid on cls columns ---
    w2 = hp_ref[C2:2 * C2, 0:out_cols]                                # (2C, out_cols), block-diag
    c2 = hp_ref[2 * C2 + 1:2 * C2 + 2, 0:out_cols]                    # (1, out_cols)
    out = jnp.dot(h1n, w2, preferred_element_type=f32) + c2           # (tb, out_cols)

    ocol = jax.lax.broadcasted_iota(jnp.int32, out.shape, 1)
    in_cls = jnp.logical_and(ocol >= reg_dim, ocol < reg_dim + cls_dim)
    out = jnp.where(in_cls, jax.nn.sigmoid(out), out)
    out_ref[...] = out.astype(out_ref.dtype)


# --------------------------------------------------------------------------
# Wrapper: host-side head fusion / param packing + the exact PyTorch reshapes.
# --------------------------------------------------------------------------
def temporal_decoder_forward(feature, spatial_hm, params, num_windows):
    T, C, H, W = feature.shape
    _, _, h, w = spatial_hm.shape
    HW, hw = H * W, h * w
    K = num_windows
    reg_dim, cls_dim = 2 * K, K
    C2 = 2 * C
    out_cols = 128 * int(pl.cdiv(reg_dim + cls_dim, 128))             # lane-dense padded width

    # ---- static bilinear operator + its column-sum (denominator by linearity) ----
    rkT = np.kron(_interp_matrix(H, h), _interp_matrix(W, w)).T.astype(np.float32)  # (hw, HW)
    dcol = 128 * int(pl.cdiv(HW, 128))
    rkt_ext_np = np.zeros((hw, dcol + 128), np.float32)
    rkt_ext_np[:, :HW] = rkT
    rkt_ext_np[:, dcol] = rkT.sum(axis=1)                             # denom operator column
    rkt_ext = jnp.asarray(rkt_ext_np)

    # ---- fold LN1 affine into Linear1, pack ALL head params into one buffer ----
    def fold(p):
        g1 = p["g1"].reshape(-1, 1)                                   # (2C, 1)
        w1f = g1 * p["w1"]                                            # (2C, C)
        c1f = p["b1"].reshape(1, -1) @ p["w1"] + p["c1"].reshape(1, -1)
        return w1f, c1f

    reg, cls = params["reg"], params["cls"]
    rw1, rc1 = fold(reg)
    cw1, cc1 = fold(cls)

    pc = max(128 * int(pl.cdiv(C2, 128)), out_cols)
    pr = 2 * C2 + 8
    hpack = jnp.zeros((pr, pc), jnp.float32)
    hpack = hpack.at[0:C2, 0:C].set(rw1).at[0:C2, C:C2].set(cw1)                       # W1_comb
    hpack = hpack.at[C2:C2 + C, 0:reg_dim].set(reg["w2"])                              # W2 (reg)
    hpack = hpack.at[C2 + C:2 * C2, reg_dim:reg_dim + cls_dim].set(cls["w2"])          # W2 (cls)
    hpack = hpack.at[2 * C2 + 0, 0:C].set(rc1[0]).at[2 * C2 + 0, C:C2].set(cc1[0])     # c1_comb
    hpack = hpack.at[2 * C2 + 1, 0:reg_dim].set(reg["c2"].reshape(-1))                 # c2 (reg)
    hpack = hpack.at[2 * C2 + 1, reg_dim:reg_dim + cls_dim].set(cls["c2"].reshape(-1)) # c2 (cls)
    hpack = hpack.at[2 * C2 + 2, 0:C].set(reg["g2"].reshape(-1))
    hpack = hpack.at[2 * C2 + 2, C:C2].set(cls["g2"].reshape(-1))
    hpack = hpack.at[2 * C2 + 3, 0:C].set(reg["b2"].reshape(-1))
    hpack = hpack.at[2 * C2 + 3, C:C2].set(cls["b2"].reshape(-1))

    feat_r = feature.reshape(T, C, HW)                                # no transpose; HW lane-dense
    hm_flat = spatial_hm.reshape(T, hw)

    # ---- grid tiles over frames; operator + params stay resident (block idx 0) ----
    tb = min(T, 64) if T % 8 == 0 else T
    grid = (int(pl.cdiv(T, tb)),)

    kernel = functools.partial(_fused_kernel, C=C, HW=HW, DCOL=dcol,
                               reg_dim=reg_dim, cls_dim=cls_dim)

    out = pl.pallas_call(
        kernel,
        out_shape=jax.ShapeDtypeStruct((T, out_cols), jnp.float32),
        grid=grid,
        in_specs=[
            pl.BlockSpec((hw, dcol + 128), lambda i: (0, 0)),         # upsample operator (resident)
            pl.BlockSpec((tb, hw), lambda i: (i, 0)),                 # spatial heatmaps
            pl.BlockSpec((tb, C, HW), lambda i: (i, 0, 0)),           # features (pipelined over T)
            pl.BlockSpec((pr, pc), lambda i: (0, 0)),                 # packed head params (resident)
        ],
        out_specs=pl.BlockSpec((tb, out_cols), lambda i: (i, 0)),
        compiler_params=pltpu.CompilerParams(dimension_semantics=("parallel",)),
    )(rkt_ext, hm_flat, feat_r, hpack)

    # Same contiguous row-major .view(...) reshapes as the PyTorch module.
    offset = out[:, :reg_dim].reshape(1, T * K, 2)
    pred_score = out[:, reg_dim:reg_dim + cls_dim].reshape(1, T * K)  # already sigmoid'd
    return offset, pred_score


# --------------------------------------------------------------------------
# Pure-JAX reference (unfused), for correctness checking.
# --------------------------------------------------------------------------
def _reference_forward(feature, spatial_hm, params, num_windows):
    T, C, H, W = feature.shape
    h, w = spatial_hm.shape[-2:]
    rkT = jnp.asarray(np.kron(_interp_matrix(H, h), _interp_matrix(W, w)).T)
    up = spatial_hm.reshape(T, h * w) @ rkT                           # (T, HW)
    feat = feature.reshape(T, C, H * W)
    num = jnp.sum(jax.nn.sigmoid(up)[:, None, :] * feat, axis=-1)
    local = num / jnp.sum(up, axis=-1, keepdims=True)
    glob = jnp.mean(feat, axis=-1)
    x = jnp.concatenate([local, glob], axis=-1)

    def ln(v, g, b):
        mu = jnp.mean(v, -1, keepdims=True)
        var = jnp.mean((v - mu) ** 2, -1, keepdims=True)
        return (v - mu) * jax.lax.rsqrt(var + 1e-5) * g + b

    def head(p):
        y = ln(x, p["g1"], p["b1"]) @ p["w1"] + p["c1"]
        y = jnp.maximum(ln(y, p["g2"], p["b2"]), 0.0)
        return y @ p["w2"] + p["c2"]

    off = head(params["reg"]).reshape(1, T * num_windows, 2)
    score = jax.nn.sigmoid(head(params["cls"])).reshape(1, T * num_windows)
    return off, score


# --------------------------------------------------------------------------
# Deterministic parameter init (shapes from TemporalDecoder.__init__).
# Linear weights are stored pre-transposed: (in_features, out_features).
# --------------------------------------------------------------------------
def init_params(key, hidden_dim, num_windows):
    C = hidden_dim

    def head(k, out_dim):
        k1, k2, k3, k4 = jax.random.split(k, 4)
        return {
            "g1": jnp.ones((1, 2 * C), jnp.float32),      # LayerNorm(2C) weight
            "b1": jnp.zeros((1, 2 * C), jnp.float32),     # LayerNorm(2C) bias
            "w1": 0.05 * jax.random.normal(k1, (2 * C, C), jnp.float32),
            "c1": 0.05 * jax.random.normal(k2, (1, C), jnp.float32),
            "g2": jnp.ones((1, C), jnp.float32),          # LayerNorm(C) weight
            "b2": jnp.zeros((1, C), jnp.float32),         # LayerNorm(C) bias
            "w2": 0.05 * jax.random.normal(k3, (C, out_dim), jnp.float32),
            "c2": 0.05 * jax.random.normal(k4, (1, out_dim), jnp.float32),
        }

    kr, kc = jax.random.split(key)
    return {"reg": head(kr, 2 * num_windows), "cls": head(kc, num_windows)}


if __name__ == "__main__":
    key = jax.random.PRNGKey(0)
    T, C, H, W = 8, 32, 16, 16          # frames, hidden_dim, feature spatial
    h, w = 8, 8                         # spatial heatmap resolution (upsampled to 16x16)
    K = 3                               # len(cfg.temporal_window_width)

    kf, khm, kp = jax.random.split(key, 3)
    feature = jax.random.normal(kf, (T, C, H, W), jnp.float32)
    spatial_hm = jax.random.normal(khm, (T, 1, h, w), jnp.float32)
    params = init_params(kp, C, K)

    fwd = jax.jit(functools.partial(temporal_decoder_forward, num_windows=K))
    offset, pred_score = fwd(feature, spatial_hm, params)
    jax.block_until_ready((offset, pred_score))

    assert offset.shape == (1, T * K, 2), offset.shape
    assert pred_score.shape == (1, T * K), pred_score.shape
    assert bool(jnp.all(jnp.isfinite(offset))) and bool(jnp.all(jnp.isfinite(pred_score)))
    assert bool(jnp.all((pred_score >= 0.0) & (pred_score <= 1.0)))

    ref_off, ref_score = _reference_forward(feature, spatial_hm, params, K)
    assert bool(jnp.allclose(offset, ref_off, atol=5e-2, rtol=5e-2)), "offset mismatch vs reference"
    assert bool(jnp.allclose(pred_score, ref_score, atol=5e-2, rtol=5e-2)), "score mismatch vs reference"
    print("KERNEL_OK")
</pallas_src>

<mosaic_0001>
module attributes {stable_mosaic.version = 11 : i64} {
  func.func @_fused_kernel(%arg0: i32, %arg1: memref<64x384xf32, #tpu.memory_space<vmem>>, %arg2: memref<8x64xf32, #tpu.memory_space<vmem>>, %arg3: memref<8x32x256xf32, #tpu.memory_space<vmem>>, %arg4: memref<136x128xf32, #tpu.memory_space<vmem>>, %arg5: memref<8x128xf32, #tpu.memory_space<vmem>>) attributes {dimension_semantics = [#tpu.dimension_semantics<parallel>], iteration_bounds = array<i64: 1>, scalar_prefetch = 0 : i64, scratch_operands = 0 : i64, tpu.core_type = #tpu.core_type<tc>, window_params = [{pipeline_mode = #tpu.pipeline_mode<synchronous>, transform_indices = @transform_0, window_bounds = array<i64: 64, 384>}, {transform_indices = @transform_1, window_bounds = array<i64: 8, 64>}, {transform_indices = @transform_2, window_bounds = array<i64: 8, 32, 256>}, {pipeline_mode = #tpu.pipeline_mode<synchronous>, transform_indices = @transform_3, window_bounds = array<i64: 136, 128>}, {transform_indices = @transform_4, window_bounds = array<i64: 8, 128>}]} {
    %c0 = arith.constant 0 : index
    %c0_0 = arith.constant 0 : index
    %0 = vector.load %arg2[%c0, %c0_0] : memref<8x64xf32, #tpu.memory_space<vmem>>, vector<8x64xf32>
    %c0_1 = arith.constant 0 : index
    %c0_2 = arith.constant 0 : index
    %1 = vector.load %arg1[%c0_1, %c0_2] : memref<64x384xf32, #tpu.memory_space<vmem>>, vector<64x384xf32>
    %cst = arith.constant dense<0.000000e+00> : vector<8x384xf32>
    %2 = tpu.matmul %0, %1, %cst {dimension_numbers = #tpu.dot_dimension_numbers<[1], [0], [0], [1], [0, 0, 1, 1], [], []>} : vector<8x64xf32>, vector<64x384xf32>, vector<8x384xf32> -> vector<8x384xf32>
    %3 = vector.extract_strided_slice %2 {offsets = [0, 0], sizes = [8, 256], strides = [1, 1]} : vector<8x384xf32> to vector<8x256xf32>
    %4 = vector.extract_strided_slice %2 {offsets = [0, 256], sizes = [8, 1], strides = [1, 1]} : vector<8x384xf32> to vector<8x1xf32>
    %c0_3 = arith.constant 0 : index
    %c0_4 = arith.constant 0 : index
    %c0_5 = arith.constant 0 : index
    %5 = vector.load %arg3[%c0_3, %c0_4, %c0_5] : memref<8x32x256xf32, #tpu.memory_space<vmem>>, vector<8x32x256xf32>
    %6 = arith.negf %3 : vector<8x256xf32>
    %7 = math.exp %6 : vector<8x256xf32>
    %cst_6 = arith.constant 1.000000e+00 : f32
    %8 = vector.broadcast %cst_6 : f32 to vector<8x256xf32>
    %9 = arith.addf %8, %7 : vector<8x256xf32>
    %10 = arith.divf %8, %9 : vector<8x256xf32>
    %11 = tpu.iota {dimensions = array<i32: 1>} : vector<8x2x256xi32>
    %c0_i32 = arith.constant 0 : i32
    %12 = vector.broadcast %c0_i32 : i32 to vector<8x2x256xi32>
    %13 = arith.cmpi eq, %11, %12 : vector<8x2x256xi32>
    %14 = vector.shape_cast %10 : vector<8x256xf32> to vector<8x1x256xf32>
    %cst_7 = arith.constant 3.906250e-03 : f32
    %15 = vector.shape_cast %14 : vector<8x1x256xf32> to vector<8x1x256xf32>
    %16 = vector.broadcast %15 : vector<8x1x256xf32> to vector<8x2x256xf32>
    %17 = vector.broadcast %cst_7 : f32 to vector<8x2x256xf32>
    %18 = arith.select %13, %16, %17 : vector<8x2x256xi1>, vector<8x2x256xf32>
    "tpu.trace_start"() <{level = 10 : i32, message = "tkn,tcn->tkc"}> : () -> ()
    %cst_8 = arith.constant dense<0.000000e+00> : vector<8x2x32xf32>
    %19 = tpu.matmul %18, %5, %cst_8 {dimension_numbers = #tpu.dot_dimension_numbers<[2], [2], [1], [1], [0, 0, 0, 1, 1, 1], [0], [0]>} : vector<8x2x256xf32>, vector<8x32x256xf32>, vector<8x2x32xf32> -> vector<8x2x32xf32>
    "tpu.trace_stop"() : () -> ()
    %20 = vector.shape_cast %19 : vector<8x2x32xf32> to vector<8x64xf32>
    %21 = tpu.iota {dimensions = array<i32: 1>} : vector<8x64xi32>
    %c32_i32 = arith.constant 32 : i32
    %22 = vector.broadcast %c32_i32 : i32 to vector<8x64xi32>
    %23 = arith.cmpi slt, %21, %22 : vector<8x64xi32>
    %cst_9 = arith.constant 1.000000e+00 : f32
    %24 = vector.broadcast %cst_9 : f32 to vector<8x1xf32>
    %25 = arith.divf %24, %4 : vector<8x1xf32>
    %26 = vector.broadcast %25 : vector<8x1xf32> to vector<8x64xf32>
    %27 = arith.mulf %20, %26 : vector<8x64xf32>
    %28 = arith.select %23, %27, %20 : vector<8x64xi1>, vector<8x64xf32>
    %cst_10 = arith.constant dense<0.000000e+00> : vector<8xf32>
    %29 = vector.multi_reduction <add>, %28, %cst_10 [1] : vector<8x64xf32> to vector<8xf32>
    %30 = vector.shape_cast %29 : vector<8xf32> to vector<8x1xf32>
    %cst_11 = arith.constant 6.400000e+01 : f32
    %31 = vector.broadcast %cst_11 : f32 to vector<8x1xf32>
    %32 = arith.divf %30, %31 : vector<8x1xf32>
    %33 = vector.broadcast %32 : vector<8x1xf32> to vector<8x64xf32>
    %34 = arith.subf %28, %33 : vector<8x64xf32>
    %35 = arith.mulf %34, %34 : vector<8x64xf32>
    %cst_12 = arith.constant dense<0.000000e+00> : vector<8xf32>
    %36 = vector.multi_reduction <add>, %35, %cst_12 [1] : vector<8x64xf32> to vector<8xf32>
    %37 = vector.shape_cast %36 : vector<8xf32> to vector<8x1xf32>
    %cst_13 = arith.constant 6.400000e+01 : f32
    %38 = vector.broadcast %cst_13 : f32 to vector<8x1xf32>
    %39 = arith.divf %37, %38 : vector<8x1xf32>
    %40 = vector.broadcast %32 : vector<8x1xf32> to vector<8x64xf32>
    %41 = arith.subf %28, %40 : vector<8x64xf32>
    %cst_14 = arith.constant 9.99999974E-6 : f32
    %42 = vector.broadcast %cst_14 : f32 to vector<8x1xf32>
    %43 = arith.addf %39, %42 : vector<8x1xf32>
    %44 = math.rsqrt %43 : vector<8x1xf32>
    %45 = vector.broadcast %44 : vector<8x1xf32> to vector<8x64xf32>
    %46 = arith.mulf %41, %45 : vector<8x64xf32>
    %c0_15 = arith.constant 0 : index
    %c0_16 = arith.constant 0 : index
    %47 = vector.load %arg4[%c0_15, %c0_16] : memref<136x128xf32, #tpu.memory_space<vmem>>, vector<64x64xf32>
    %c128 = arith.constant 128 : index
    %c0_17 = arith.constant 0 : index
    %48 = vector.load %arg4[%c128, %c0_17] : memref<136x128xf32, #tpu.memory_space<vmem>>, vector<1x64xf32>
    %cst_18 = arith.constant dense<0.000000e+00> : vector<8x64xf32>
    %49 = tpu.matmul %46, %47, %cst_18 {dimension_numbers = #tpu.dot_dimension_numbers<[1], [0], [0], [1], [0, 0, 1, 1], [], []>} : vector<8x64xf32>, vector<64x64xf32>, vector<8x64xf32> -> vector<8x64xf32>
    %50 = vector.broadcast %48 : vector<1x64xf32> to vector<8x64xf32>
    %51 = arith.addf %49, %50 : vector<8x64xf32>
    %c130 = arith.constant 130 : index
    %c0_19 = arith.constant 0 : index
    %52 = vector.load %arg4[%c130, %c0_19] : memref<136x128xf32, #tpu.memory_space<vmem>>, vector<1x64xf32>
    %c131 = arith.constant 131 : index
    %c0_20 = arith.constant 0 : index
    %53 = vector.load %arg4[%c131, %c0_20] : memref<136x128xf32, #tpu.memory_space<vmem>>, vector<1x64xf32>
    %cst_21 = arith.constant 0.000000e+00 : f32
    %54 = vector.broadcast %cst_21 : f32 to vector<8x64xf32>
    %55 = arith.select %23, %51, %54 : vector<8x64xi1>, vector<8x64xf32>
    %cst_22 = arith.constant dense<0.000000e+00> : vector<8xf32>
    %56 = vector.multi_reduction <add>, %55, %cst_22 [1] : vector<8x64xf32> to vector<8xf32>
    %57 = vector.shape_cast %56 : vector<8xf32> to vector<8x1xf32>
    %cst_23 = arith.constant 3.125000e-02 : f32
    %58 = vector.broadcast %cst_23 : f32 to vector<8x1xf32>
    %59 = arith.mulf %57, %58 : vector<8x1xf32>
    %cst_24 = arith.constant 0.000000e+00 : f32
    %60 = vector.broadcast %cst_24 : f32 to vector<8x64xf32>
    %61 = arith.select %23, %60, %51 : vector<8x64xi1>, vector<8x64xf32>
    %cst_25 = arith.constant dense<0.000000e+00> : vector<8xf32>
    %62 = vector.multi_reduction <add>, %61, %cst_25 [1] : vector<8x64xf32> to vector<8xf32>
    %63 = vector.shape_cast %62 : vector<8xf32> to vector<8x1xf32>
    %cst_26 = arith.constant 3.125000e-02 : f32
    %64 = vector.broadcast %cst_26 : f32 to vector<8x1xf32>
    %65 = arith.mulf %63, %64 : vector<8x1xf32>
    %66 = vector.shape_cast %59 : vector<8x1xf32> to vector<8x1xf32>
    %67 = vector.broadcast %66 : vector<8x1xf32> to vector<8x64xf32>
    %68 = vector.shape_cast %65 : vector<8x1xf32> to vector<8x1xf32>
    %69 = vector.broadcast %68 : vector<8x1xf32> to vector<8x64xf32>
    %70 = arith.select %23, %67, %69 : vector<8x64xi1>, vector<8x64xf32>
    %71 = arith.subf %51, %70 : vector<8x64xf32>
    %72 = arith.mulf %71, %71 : vector<8x64xf32>
    %cst_27 = arith.constant 0.000000e+00 : f32
    %73 = vector.broadcast %cst_27 : f32 to vector<8x64xf32>
    %74 = arith.select %23, %72, %73 : vector<8x64xi1>, vector<8x64xf32>
    %cst_28 = arith.constant dense<0.000000e+00> : vector<8xf32>
    %75 = vector.multi_reduction <add>, %74, %cst_28 [1] : vector<8x64xf32> to vector<8xf32>
    %76 = vector.shape_cast %75 : vector<8xf32> to vector<8x1xf32>
    %cst_29 = arith.constant 3.125000e-02 : f32
    %77 = vector.broadcast %cst_29 : f32 to vector<8x1xf32>
    %78 = arith.mulf %76, %77 : vector<8x1xf32>
    %79 = arith.mulf %71, %71 : vector<8x64xf32>
    %cst_30 = arith.constant 0.000000e+00 : f32
    %80 = vector.broadcast %cst_30 : f32 to vector<8x64xf32>
    %81 = arith.select %23, %80, %79 : vector<8x64xi1>, vector<8x64xf32>
    %cst_31 = arith.constant dense<0.000000e+00> : vector<8xf32>
    %82 = vector.multi_reduction <add>, %81, %cst_31 [1] : vector<8x64xf32> to vector<8xf32>
    %83 = vector.shape_cast %82 : vector<8xf32> to vector<8x1xf32>
    %cst_32 = arith.constant 3.125000e-02 : f32
    %84 = vector.broadcast %cst_32 : f32 to vector<8x1xf32>
    %85 = arith.mulf %83, %84 : vector<8x1xf32>
    %86 = vector.shape_cast %78 : vector<8x1xf32> to vector<8x1xf32>
    %87 = vector.broadcast %86 : vector<8x1xf32> to vector<8x64xf32>
    %88 = vector.shape_cast %85 : vector<8x1xf32> to vector<8x1xf32>
    %89 = vector.broadcast %88 : vector<8x1xf32> to vector<8x64xf32>
    %90 = arith.select %23, %87, %89 : vector<8x64xi1>, vector<8x64xf32>
    %cst_33 = arith.constant 9.99999974E-6 : f32
    %91 = vector.broadcast %cst_33 : f32 to vector<8x64xf32>
    %92 = arith.addf %90, %91 : vector<8x64xf32>
    %93 = math.rsqrt %92 : vector<8x64xf32>
    %94 = arith.mulf %71, %93 : vector<8x64xf32>
    %95 = vector.broadcast %52 : vector<1x64xf32> to vector<8x64xf32>
    %96 = arith.mulf %94, %95 : vector<8x64xf32>
    %97 = vector.broadcast %53 : vector<1x64xf32> to vector<8x64xf32>
    %98 = arith.addf %96, %97 : vector<8x64xf32>
    %cst_34 = arith.constant 0.000000e+00 : f32
    %99 = vector.broadcast %cst_34 : f32 to vector<8x64xf32>
    %100 = arith.maximumf %98, %99 : vector<8x64xf32>
    %c64 = arith.constant 64 : index
    %c0_35 = arith.constant 0 : index
    %101 = vector.load %arg4[%c64, %c0_35] : memref<136x128xf32, #tpu.memory_space<vmem>>, vector<64x128xf32>
    %c129 = arith.constant 129 : index
    %c0_36 = arith.constant 0 : index
    %102 = vector.load %arg4[%c129, %c0_36] : memref<136x128xf32, #tpu.memory_space<vmem>>, vector<1x128xf32>
    %cst_37 = arith.constant dense<0.000000e+00> : vector<8x128xf32>
    %103 = tpu.matmul %100, %101, %cst_37 {dimension_numbers = #tpu.dot_dimension_numbers<[1], [0], [0], [1], [0, 0, 1, 1], [], []>} : vector<8x64xf32>, vector<64x128xf32>, vector<8x128xf32> -> vector<8x128xf32>
    %104 = vector.broadcast %102 : vector<1x128xf32> to vector<8x128xf32>
    %105 = arith.addf %103, %104 : vector<8x128xf32>
    %106 = tpu.iota {dimensions = array<i32: 1>} : vector<8x128xi32>
    %c6_i32 = arith.constant 6 : i32
    %107 = vector.broadcast %c6_i32 : i32 to vector<8x128xi32>
    %108 = arith.cmpi sge, %106, %107 : vector<8x128xi32>
    %c9_i32 = arith.constant 9 : i32
    %109 = vector.broadcast %c9_i32 : i32 to vector<8x128xi32>
    %110 = arith.cmpi slt, %106, %109 : vector<8x128xi32>
    %111 = arith.andi %108, %110 : vector<8x128xi1>
    %112 = arith.negf %105 : vector<8x128xf32>
    %113 = math.exp %112 : vector<8x128xf32>
    %cst_38 = arith.constant 1.000000e+00 : f32
    %114 = vector.broadcast %cst_38 : f32 to vector<8x128xf32>
    %115 = arith.addf %114, %113 : vector<8x128xf32>
    %116 = arith.divf %114, %115 : vector<8x128xf32>
    %117 = arith.select %111, %116, %105 : vector<8x128xi1>, vector<8x128xf32>
    %c0_39 = arith.constant 0 : index
    %c0_40 = arith.constant 0 : index
    %118 = vector.load %arg5[%c0_39, %c0_40] : memref<8x128xf32, #tpu.memory_space<vmem>>, vector<8x128xf32>
    tpu.vector_store %arg5[%c0_39, %c0_40], %117 {strides = array<i32>} : memref<8x128xf32, #tpu.memory_space<vmem>>, vector<8x128xf32>,
    return
  }
  func.func @transform_0(%arg0: i32) -> (i32, i32) {
    %c0_i32 = arith.constant 0 : i32
    %c0_i32_0 = arith.constant 0 : i32
    %c0_i32_1 = arith.constant 0 : i32
    return %c0_i32, %c0_i32_0 : i32, i32
  }
  func.func @transform_1(%arg0: i32) -> (i32, i32) {
    %c0_i32 = arith.constant 0 : i32
    %c0_i32_0 = arith.constant 0 : i32
    return %arg0, %c0_i32 : i32, i32
  }
  func.func @transform_2(%arg0: i32) -> (i32, i32, i32) {
    %c0_i32 = arith.constant 0 : i32
    %c0_i32_0 = arith.constant 0 : i32
    %c0_i32_1 = arith.constant 0 : i32
    return %arg0, %c0_i32, %c0_i32_0 : i32, i32, i32
  }
  func.func @transform_3(%arg0: i32) -> (i32, i32) {
    %c0_i32 = arith.constant 0 : i32
    %c0_i32_0 = arith.constant 0 : i32
    %c0_i32_1 = arith.constant 0 : i32
    return %c0_i32, %c0_i32_0 : i32, i32
  }
  func.func @transform_4(%arg0: i32) -> (i32, i32) {
    %c0_i32 = arith.constant 0 : i32
    %c0_i32_0 = arith.constant 0 : i32
    return %arg0, %c0_i32 : i32, i32
  }
}

</mosaic_0001>

<bundles_post_ra>
// kernel: temporal_decoder_forward.1
= control target key start
LH: loop header
LB: loop body
LE: loop exit
PB: predicated region body
PF: predicated region fallthrough
CT: control target
= control target key end

     0   :  { %vm42_vm0 = vcmask 523264   ;;  %vm214_vm7 = vcmask 1040384   ;;  %vm216_vm9 = vcmask 1041409   ;;  %vm219_vm10 = vcmask 1042434   ;;  %s1349_s0 = inlined_call_operand.vmem [shape: f32[64,384], index: 0, kind: input, shape index: {}]   ;;  %s1350_s1 = inlined_call_operand.vmem [shape: f32[8,64], index: 1, kind: input, shape index: {}]   ;;  %s1351_s2 = inlined_call_operand.vmem [shape: f32[8,32,256], index: 2, kind: input, shape index: {}]   ;;  %s1352_s3 = inlined_call_operand.vmem [shape: f32[136,128], index: 3, kind: input, shape index: {}]   ;;  %s1353_s4 = inlined_call_operand.vmem [shape: f32[8,128], index: 4, kind: output, shape index: {}]  }
   0x1   :  { %v39_v0 = vld [vmem:[%s1349_s0 + $0xa8] sm:$0xff]  ;;  %v40_v1 = vld [vmem:[%s1349_s0 + $0xb0] sm:$0xff]  ;;  %v37_v3 = vld [vmem:[%s1349_s0 + $0x98] sm:$0xff]  ;;  %vm222_vm12 = vcmask 1043459   ;;  %vm225_vm14 = vcmask 1044484   ;;  %vm228_vm15 = vcmask 1045509  }
   0x2   :  { %v36_v2 = vld [vmem:[%s1349_s0 + $0x90] sm:$0xff]  ;;  %54 = vmatpush.msra.mxu0 %v39_v0  ;;  %74 = vmatpush.msra.mxu1 %v40_v1  ;;  %v33_v4 = vld [vmem:[%s1349_s0 + $0x78] sm:$0xff]  ;;  %v34_v5 = vld [vmem:[%s1349_s0 + $0x80] sm:$0xff] }
   0x3   :  { %v30_v6 = vld [vmem:[%s1349_s0 + $0x60] sm:$0xff]  ;;  %v31_v7 = vld [vmem:[%s1349_s0 + $0x68] sm:$0xff]  ;;  %v41_v8 = vld [vmem:[%s1349_s0 + $0xb8] sm:$0xff] }
   0x4   :  { %55 = vmatpush.msra.mxu0 %v36_v2  ;;  %75 = vmatpush.msra.mxu1 %v37_v3  ;;  %v27_v9 = vld [vmem:[%s1349_s0 + $0x48] sm:$0xff]  ;;  %v28_v10 = vld [vmem:[%s1349_s0 + $0x50] sm:$0xff]  ;;  %v38_v11 = vld [vmem:[%s1349_s0 + $0xa0] sm:$0xff] }
   0x5   :  { %94 = vmatpush.msra.mxu2 %v41_v8  ;;  %v24_v12 = vld [vmem:[%s1349_s0 + $0x30] sm:$0xff]  ;;  %v25_v13 = vld [vmem:[%s1349_s0 + $0x38] sm:$0xff]  ;;  %v22_v15 = vld [vmem:[%s1349_s0 + $0x20] sm:$0xff] }
   0x6   :  { %56 = vmatpush.msra.mxu0 %v33_v4  ;;  %76 = vmatpush.msra.mxu1 %v34_v5  ;;  %v21_v14 = vld [vmem:[%s1349_s0 + $0x18] sm:$0xff]  ;;  %v18_v16 = vld [vmem:[%s1349_s0] sm:$0xff]  ;;  %v19_v17 = vld [vmem:[%s1349_s0 + $0x8] sm:$0xff] }
   0x7   :  { %95 = vmatpush.msra.mxu2 %v38_v11  ;;  %v17_v18 = vld [vmem:[%s1350_s1] sm:$0xff]  ;;  %v35_v19 = vld [vmem:[%s1349_s0 + $0x88] sm:$0xff]  ;;  %v32_v20 = vld [vmem:[%s1349_s0 + $0x70] sm:$0xff]  ;;  %v208_v11 = vlaneseq }
   0x8   :  { %57 = vmatpush.msra.mxu0 %v30_v6  ;;  %77 = vmatpush.msra.mxu1 %v31_v7  ;;  %v29_v21 = vld [vmem:[%s1349_s0 + $0x58] sm:$0xff]  ;;  %v26_v22 = vld [vmem:[%s1349_s0 + $0x40] sm:$0xff]  ;;  %v23_v23 = vld [vmem:[%s1349_s0 + $0x28] sm:$0xff] }
   0x9   :  { %96 = vmatpush.msra.mxu2 %v35_v19  ;;  %v112_v24 = vld [vmem:[%s1351_s2 + $0x30] sm:$0xff]  ;;  %v113_v25 = vld [vmem:[%s1351_s2 + $0x38] sm:$0xff]  ;;  %v110_v29 = vld [vmem:[%s1351_s2 + $0x20] sm:$0xff] }
   0xa   :  { %58 = vmatpush.msra.mxu0 %v27_v9  ;;  %78 = vmatpush.msra.mxu1 %v28_v10  ;;  %v20_v26 = vld [vmem:[%s1349_s0 + $0x10] sm:$0xff]  ;;  %v121_v28 = vld [vmem:[%s1351_s2 + $0x78] sm:$0xff]  ;;  %v111_v30 = vld [vmem:[%s1351_s2 + $0x28] sm:$0xff] }
   0xb   :  { %97 = vmatpush.msra.mxu2 %v32_v20  ;;  %297 = vmatpush.xpose.msra.mxu3 %v112_v24  ;;  %v120_v27 = vld [vmem:[%s1351_s2 + $0x70] sm:$0xff]  ;;  %v118_v31 = vld [vmem:[%s1351_s2 + $0x60] sm:$0xff]  ;;  %v119_v32 = vld [vmem:[%s1351_s2 + $0x68] sm:$0xff]  ;;  %v1092_v20 = vshrl.u32 %v208_v11, 7 }
   0xc   :  { %59 = vmatpush.msra.mxu0 %v24_v12  ;;  %79 = vmatpush.msra.mxu1 %v25_v13  ;;  %v108_v33 = vld [vmem:[%s1351_s2 + $0x10] sm:$0xff]  ;;  %v109_v34 = vld [vmem:[%s1351_s2 + $0x18] sm:$0xff]  ;;  %v106_v37 = vld [vmem:[%s1351_s2] sm:$0xff] }
   0xd   :  { %98 = vmatpush.msra.mxu2 %v29_v21  ;;  %v116_v35 = vld [vmem:[%s1351_s2 + $0x50] sm:$0xff]  ;;  %v117_v36 = vld [vmem:[%s1351_s2 + $0x58] sm:$0xff]  ;;  %v107_v38 = vld [vmem:[%s1351_s2 + $0x8] sm:$0xff]  ;;  %vm210_vm13 = vcmp.eq.s32.totalorder %v1092_v20, 0 }
   0xe   :  { %60 = vmatpush.msra.mxu0 %v21_v14  ;;  %80 = vmatpush.msra.mxu1 %v22_v15  ;;  %v128_v39 = vld [vmem:[%s1351_s2 + $0xb0] sm:$0xff]  ;;  %v129_v40 = vld [vmem:[%s1351_s2 + $0xb8] sm:$0xff]  ;;  %v114_v41 = vld [vmem:[%s1351_s2 + $0x40] sm:$0xff] }
   0xf   :  { %99 = vmatpush.msra.mxu2 %v26_v22  ;;  %298 = vmatpush.xpose.msra.mxu3 %v110_v29  ;;  %v115_v42 = vld [vmem:[%s1351_s2 + $0x48] sm:$0xff]  ;;  %v136_v43 = vld [vmem:[%s1351_s2 + $0xf0] sm:$0xff]  ;;  %v137_v44 = vld [vmem:[%s1351_s2 + $0xf8] sm:$0xff] }
  0x10   :  { %61 = vmatpush.msra.mxu0 %v18_v16  ;;  %81 = vmatpush.msra.mxu1 %v19_v17  ;;  %v126_v45 = vld [vmem:[%s1351_s2 + $0xa0] sm:$0xff]  ;;  %v127_v46 = vld [vmem:[%s1351_s2 + $0xa8] sm:$0xff]  ;;  %v124_v49 = vld [vmem:[%s1351_s2 + $0x90] sm:$0xff] }
  0x11   :  { %843 = vmatmul.msk.f32.vlgmr.msra.gmra.mxu0 %vm42_vm0, %v17_v18  ;;  %844 = vmatmul.msk.f32.vlgmr.msra.gmra.mxu1 %vm42_vm0, %v17_v18  ;;  %v134_v47 = vld [vmem:[%s1351_s2 + $0xe0] sm:$0xff]  ;;  %v135_v48 = vld [vmem:[%s1351_s2 + $0xe8] sm:$0xff]  ;;  %v125_v50 = vld [vmem:[%s1351_s2 + $0x98] sm:$0xff] }
  0x12   :  { %100 = vmatpush.msra.mxu2 %v23_v23  ;;  %317 = vmatpush.xpose.msrb.mxu0 %v113_v25  ;;  %v132_v51 = vld [vmem:[%s1351_s2 + $0xd0] sm:$0xff]  ;;  %v133_v52 = vld [vmem:[%s1351_s2 + $0xd8] sm:$0xff]  ;;  %v122_v55 = vld [vmem:[%s1351_s2 + $0x80] sm:$0xff] }
  0x13   :  { %337 = vmatpush.xpose.msrb.mxu1 %v120_v27  ;;  %299 = vmatpush.xpose.msra.mxu3 %v108_v33  ;;  %v123_v56 = vld [vmem:[%s1351_s2 + $0x88] sm:$0xff]  ;;  %v130_v59 = vld [vmem:[%s1351_s2 + $0xc0] sm:$0xff] }
  0x14   :  { %101 = vmatpush.msra.mxu2 %v20_v26  ;;  %v131_v60 = vld [vmem:[%s1351_s2 + $0xc8] sm:$0xff] }
  0x15   :  { %845 = vmatmul.msk.f32.vlgmr.msra.gmra.mxu2 %vm42_vm0, %v17_v18  ;;  %v159_v14 = vld [vmem:[%s1351_s2 + $0x1a8] sm:$0xff] }
  0x16   :  { %357 = vmatpush.xpose.msrb.mxu2 %v121_v28  ;;  %318 = vmatpush.xpose.msrb.mxu0 %v111_v30 }
  0x17   :  { %338 = vmatpush.xpose.msrb.mxu1 %v118_v31  ;;  %300 = vmatpush.xpose.msra.mxu3 %v106_v37  ;;  %v144_v31 = vld [vmem:[%s1351_s2 + $0x130] sm:$0xff] }
  0x1a   :  { %358 = vmatpush.xpose.msrb.mxu2 %v119_v32  ;;  %319 = vmatpush.xpose.msrb.mxu0 %v109_v34  ;;  %v145_v32 = vld [vmem:[%s1351_s2 + $0x138] sm:$0xff] }
  0x1b   :  { %339 = vmatpush.xpose.msrb.mxu1 %v116_v35  ;;  %377 = vmatpush.xpose.msrb.mxu3 %v128_v39  ;;  %v152_v39 = vld [vmem:[%s1351_s2 + $0x170] sm:$0xff] }
  0x1e   :  { %359 = vmatpush.xpose.msrb.mxu2 %v117_v36  ;;  %320 = vmatpush.xpose.msrb.mxu0 %v107_v38 }
  0x1f   :  { %340 = vmatpush.xpose.msrb.mxu1 %v114_v41  ;;  %378 = vmatpush.xpose.msrb.mxu3 %v126_v45  ;;  %v143_v45 = vld [vmem:[%s1351_s2 + $0x128] sm:$0xff] }
  0x22   :  { %397 = vmatpush.xpose.msra.mxu0 %v129_v40  ;;  %360 = vmatpush.xpose.msrb.mxu2 %v115_v42  ;;  %v153_v40 = vld [vmem:[%s1351_s2 + $0x178] sm:$0xff] }
  0x23   :  { %417 = vmatpush.xpose.msra.mxu1 %v136_v43  ;;  %379 = vmatpush.xpose.msrb.mxu3 %v124_v49  ;;  %v151_v49 = vld [vmem:[%s1351_s2 + $0x168] sm:$0xff] }
  0x26   :  { %437 = vmatpush.xpose.msra.mxu2 %v137_v44  ;;  %398 = vmatpush.xpose.msra.mxu0 %v127_v46  ;;  %v142_v44 = vld [vmem:[%s1351_s2 + $0x120] sm:$0xff] }
  0x27   :  { %418 = vmatpush.xpose.msra.mxu1 %v134_v47  ;;  %380 = vmatpush.xpose.msrb.mxu3 %v122_v55 }
  0x2a   :  { %438 = vmatpush.xpose.msra.mxu2 %v135_v48  ;;  %399 = vmatpush.xpose.msra.mxu0 %v125_v50  ;;  %v150_v48 = vld [vmem:[%s1351_s2 + $0x160] sm:$0xff] }
  0x2b   :  { %419 = vmatpush.xpose.msra.mxu1 %v132_v51 }
  0x2e   :  { %439 = vmatpush.xpose.msra.mxu2 %v133_v52  ;;  %400 = vmatpush.xpose.msra.mxu0 %v123_v56 }
  0x2f   :  { %420 = vmatpush.xpose.msra.mxu1 %v130_v59  ;;  %v149_v59 = vld [vmem:[%s1351_s2 + $0x158] sm:$0xff] }
  0x32   :  { %440 = vmatpush.xpose.msra.mxu2 %v131_v60 }
  0x8e   :  { %v63_v53 = vpop.f32.mrf.mxu0  ;;  %v83_v54 = vpop.f32.mrf.mxu1 }
  0x8f   :  { %v846_v57 = vmul.f32 -1.442695, %v63_v53  ;;  %v847_v58 = vmul.f32 -1.442695, %v83_v54  ;;  %v140_v53 = vld [vmem:[%s1351_s2 + $0x110] sm:$0xff]  ;;  %v141_v54 = vld [vmem:[%s1351_s2 + $0x118] sm:$0xff] }
  0x91   :  { %861 = vpow2.f32 %v846_v57 }
  0x92   :  { %863 = vpow2.f32 %v847_v58  ;;  %v148_v58 = vld [vmem:[%s1351_s2 + $0x150] sm:$0xff] }
  0x97   :  { %v862_v61 = vpop.eup %861 }
  0x98   :  { %v864_v62 = vpop.eup %863  ;;  %v176_v63 = vadd.f32 1.0, %v862_v61 }
  0x99   :  { %v177_v0 = vadd.f32 1.0, %v864_v62 }
  0x9a   :  { %865 = vrcp.f32 %v176_v63  ;;  %vm183_vm3 = vweird.f32 %v176_v63  ;;  %v189_v13 = vand.u32 2147483648, %v176_v63  ;;  %v187_v15 = vand.u32 2147483647, %v176_v63 }
  0x9b   :  { %867 = vrcp.f32 %v177_v0  ;;  %v204_v8 = vand.u32 2147483648, %v177_v0  ;;  %v202_v10 = vand.u32 2147483647, %v177_v0  ;;  %vm198_vm5 = vweird.f32 %v177_v0 }
  0x9c   :  { %v190_v21 = vor.u32 1.1754944e-38, %v189_v13  ;;  %vm188_vm11 = vcmp.eq.f32.partialorder %v187_v15, 8.507059e+37  ;;  %v158_v13 = vld [vmem:[%s1351_s2 + $0x1a0] sm:$0xff] }
  0x9d   :  { %v205_v17 = vor.u32 1.1754944e-38, %v204_v8  ;;  %vm203_vm8 = vcmp.eq.f32.partialorder %v202_v10, 8.507059e+37  ;;  %v168_v8 = vld [vmem:[%s1351_s2 + $0x1f0] sm:$0xff] }
  0xa0   :  { %v866_v1 = vpop.eup %865 }
  0xa1   :  { %v868_v2 = vpop.eup %867  ;;  %v179_v3 = vmul.f32 %v866_v1, %v176_v63  ;;  %vm184_vm1 = vweird.f32 %v866_v1  ;;  %v138_v63 = vld [vmem:[%s1351_s2 + $0x100] sm:$0xff] }
  0xa2   :  { %v194_v4 = vmul.f32 %v868_v2, %v177_v0  ;;  %vm199_vm2 = vweird.f32 %v868_v2  ;;  %vm1085_vm4 = vmor %vm183_vm3, %vm184_vm1  ;;  %v139_v0 = vld [vmem:[%s1351_s2 + $0x108] sm:$0xff]  ;;  %vm231_vm1 = vcmask 1046534   ;;  %vm606_vm3 = vcmask 1047556  }
  0xa3   :  { %v180_v5 = vsub.f32 1.0, %v179_v3  ;;  %vm200_vm6 = vmor %vm198_vm5, %vm199_vm2  ;;  %v161_v3 = vld [vmem:[%s1351_s2 + $0x1b8] sm:$0xff]  ;;  %vm234_vm2 = vcmask 1046528  }
  0xa4   :  { %v195_v6 = vsub.f32 1.0, %v194_v4  ;;  %v146_v4 = vld [vmem:[%s1351_s2 + $0x140] sm:$0xff] }
  0xa5   :  { %v181_v7 = vmul.f32 %v866_v1, %v180_v5  ;;  %v147_v5 = vld [vmem:[%s1351_s2 + $0x148] sm:$0xff] }
  0xa6   :  { %v196_v9 = vmul.f32 %v868_v2, %v195_v6 }
  0xa7   :  { %v182_v12 = vadd.f32 %v866_v1, %v181_v7 }
  0xa8   :  { %v197_v16 = vadd.f32 %v868_v2, %v196_v9  ;;  %v169_v9 = vld [vmem:[%s1351_s2 + $0x1f8] sm:$0xff] }
  0xa9   :  { %v186_v18 = vsel %vm1085_vm4, %v866_v1, %v182_v12 }
  0xaa   :  { %v201_v19 = vsel %vm200_vm6, %v868_v2, %v197_v16  ;;  %v1096_v24 = vsel %vm188_vm11, %v190_v21, %v186_v18  ;;  %v160_v2 = vld [vmem:[%s1351_s2 + $0x1b0] sm:$0xff]  ;;  %v167_v18 = vld [vmem:[%s1351_s2 + $0x1e8] sm:$0xff] }
  0xab   :  { %v206_v22 = vsel %vm203_vm8, %v205_v17, %v201_v19  ;;  %v166_v17 = vld [vmem:[%s1351_s2 + $0x1e0] sm:$0xff]  ;;  %vm650_vm8 = vcmask 261120  }
  0xac   :  { %v1094_v23 = vrot.slane %v206_v22, 7 }
  0xae   :  { %v215_v25 = vsel %vm214_vm7, %v1096_v24, %v1094_v23  ;;  %v217_v26 = vsel %vm216_vm9, %v1096_v24, %v1094_v23  ;;  %v220_v27 = vsel %vm219_vm10, %v1096_v24, %v1094_v23  ;;  %v223_v34 = vsel %vm222_vm12, %v1096_v24, %v1094_v23 }
  0xaf   :  { %v237_v28 = vperm.slane %v215_v25, 0  ;;  %v238_v29 = vperm.slane %v215_v25, 1  ;;  %v218_v30 = vrot.slane %v217_v26, 1  ;;  %v221_v33 = vrot.slane %v220_v27, 2  ;;  %v156_v25 = vld [vmem:[%s1351_s2 + $0x190] sm:$0xff]  ;;  %v157_v26 = vld [vmem:[%s1351_s2 + $0x198] sm:$0xff] }
  0xb0   :  { %v224_v43 = vrot.slane %v223_v34, 3  ;;  %v226_v52 = vsel %vm225_vm14, %v1096_v24, %v1094_v23  ;;  %v229_v57 = vsel %vm228_vm15, %v1096_v24, %v1094_v23  ;;  %v232_v19 = vsel %vm231_vm1, %v1096_v24, %v1094_v23  ;;  %v162_v34 = vld [vmem:[%s1351_s2 + $0x1c0] sm:$0xff] }
  0xb1   :  { %v269_v35 = vsel %vm210_vm13, %v237_v28, 0.00390625  ;;  %v270_v36 = vsel %vm210_vm13, %v238_v29, 0.00390625  ;;  %v239_v37 = vperm.slane %v218_v30, 0  ;;  %v240_v38 = vperm.slane %v218_v30, 1  ;;  %v164_v29 = vld [vmem:[%s1351_s2 + $0x1d0] sm:$0xff]  ;;  %v165_v30 = vld [vmem:[%s1351_s2 + $0x1d8] sm:$0xff] }
  0xb2   :  { %301 = vmatmul.f32.vlgmr.msra.gmra.mxu3 %v269_v35  ;;  %321 = vmatmul.f32.vlgmr.msrb.gmra.mxu0 %v270_v36  ;;  %v241_v46 = vperm.slane %v221_v33, 0  ;;  %v242_v47 = vperm.slane %v221_v33, 1  ;;  %v243_v50 = vperm.slane %v224_v43, 0  ;;  %v244_v51 = vperm.slane %v224_v43, 1  ;;  %v163_v35 = vld [vmem:[%s1351_s2 + $0x1c8] sm:$0xff] }
  0xb3   :  { %457 = vmatpush.xpose.msra.mxu3 %v144_v31  ;;  %477 = vmatpush.xpose.msrb.mxu0 %v145_v32  ;;  %v271_v41 = vsel %vm210_vm13, %v239_v37, 0.00390625  ;;  %v272_v42 = vsel %vm210_vm13, %v240_v38, 0.00390625  ;;  %v227_v60 = vrot.slane %v226_v52, 4  ;;  %v230_v1 = vrot.slane %v229_v57, 5  ;;  %v154_v32 = vld [vmem:[%s1351_s2 + $0x180] sm:$0xff] }
  0xb4   :  { %341 = vmatmul.f32.vlgmr.msrb.gmra.mxu1 %v271_v41  ;;  %361 = vmatmul.f32.vlgmr.msrb.gmra.mxu2 %v272_v42  ;;  %v273_v55 = vsel %vm210_vm13, %v241_v46, 0.00390625  ;;  %v274_v56 = vsel %vm210_vm13, %v242_v47, 0.00390625  ;;  %v275_v61 = vsel %vm210_vm13, %v243_v50, 0.00390625  ;;  %v276_v62 = vsel %vm210_vm13, %v244_v51, 0.00390625  ;;  %v1243_v42 = vpop.f32.mrf.mxu2 }
  0xb5   :  { %497 = vmatpush.xpose.msrb.mxu1 %v152_v39  ;;  %517 = vmatpush.xpose.msrb.mxu2 %v153_v40  ;;  %v245_v6 = vperm.slane %v227_v60, 0  ;;  %v246_v7 = vperm.slane %v227_v60, 1  ;;  %v247_v10 = vperm.slane %v230_v1, 0  ;;  %v248_v12 = vperm.slane %v230_v1, 1 }
  0xb6   :  { %v235_v27 = vsel %vm234_vm2, %v1094_v23, %v1096_v24  ;;  %v233_v28 = vrot.slane %v232_v19, 6  ;;  %v155_v23 = vld [vmem:[%s1351_s2 + $0x188] sm:$0xff]  ;;  %v881_v51 = vmov 0   ;;  %869 = vrcp.f32 %v1243_v42  ;;  %s884_s2 = smov 32  }
  0xb7   :  { %458 = vmatpush.xpose.msra.mxu3 %v142_v44  ;;  %478 = vmatpush.xpose.msrb.mxu0 %v143_v45  ;;  %v277_v15 = vsel %vm210_vm13, %v245_v6, 0.00390625  ;;  %v278_v16 = vsel %vm210_vm13, %v246_v7, 0.00390625  ;;  %v279_v21 = vsel %vm210_vm13, %v247_v10, 0.00390625  ;;  %v280_v22 = vsel %vm210_vm13, %v248_v12, 0.00390625 }
  0xb8   :  { %v236_v31 = vrot.slane %v235_v27, 7  ;;  %v249_v24 = vperm.slane %v233_v28, 0  ;;  %v250_v33 = vperm.slane %v233_v28, 1  ;;  %856 = vset.pattern.permute.xlu0 %v881_v51  ;;  %v883_v7 = vmov 1934713408  }
  0xb9   :  { %498 = vmatpush.xpose.msrb.mxu1 %v150_v48  ;;  %518 = vmatpush.xpose.msrb.mxu2 %v151_v49  ;;  %vm660_vm4 = vweird.f32 %v1243_v42 }
  0xba   :  { %381 = vmatmul.f32.vlgmr.msrb.gmra.mxu3 %v273_v55  ;;  %401 = vmatmul.f32.vlgmr.msra.gmra.mxu0 %v274_v56  ;;  %v251_v36 = vperm.slane %v236_v31, 0  ;;  %v252_v37 = vperm.slane %v236_v31, 1  ;;  %v281_v38 = vsel %vm210_vm13, %v249_v24, 0.00390625  ;;  %v282_v39 = vsel %vm210_vm13, %v250_v33, 0.00390625 }
  0xbb   :  { %459 = vmatpush.xpose.msra.mxu3 %v140_v53  ;;  %479 = vmatpush.xpose.msrb.mxu0 %v141_v54  ;;  %v882_v54 = vmov 1983009808  }
  0xbc   :  { %421 = vmatmul.f32.vlgmr.msra.gmra.mxu1 %v275_v61  ;;  %441 = vmatmul.f32.vlgmr.msra.gmra.mxu2 %v276_v62  ;;  %v283_v40 = vsel %vm210_vm13, %v251_v36, 0.00390625  ;;  %v284_v41 = vsel %vm210_vm13, %v252_v37, 0.00390625  ;;  %v609_v55 = vunpack.c.l.s4 %v882_v54  ;;  %v666_v36 = vand.u32 2147483648, %v1243_v42 }
  0xbd   :  { %499 = vmatpush.xpose.msrb.mxu1 %v148_v58  ;;  %519 = vmatpush.xpose.msrb.mxu2 %v149_v59 }
  0xbe   :  { %v610_v62 = vunpack.c.0.s8 %v609_v55 }
  0xbf   :  { %460 = vmatpush.xpose.msra.mxu3 %v138_v63  ;;  %480 = vmatpush.xpose.msrb.mxu0 %v139_v0 }
  0xc1   :  { %500 = vmatpush.xpose.msrb.mxu1 %v146_v4  ;;  %520 = vmatpush.xpose.msrb.mxu2 %v147_v5  ;;  %v870_v4 = vpop.eup %869 }
  0xc2   :  { %461 = vmatmul.f32.vlgmr.msra.gmra.mxu3 %v277_v15  ;;  %481 = vmatmul.f32.vlgmr.msrb.gmra.mxu0 %v278_v16  ;;  %v656_v15 = vmul.f32 %v870_v4, %v1243_v42  ;;  %vm661_vm5 = vweird.f32 %v870_v4 }
  0xc3   :  { %537 = vmatpush.xpose.msrb.mxu3 %v160_v2  ;;  %557 = vmatpush.xpose.msra.mxu0 %v161_v3  ;;  %vm662_vm6 = vmor %vm660_vm4, %vm661_vm5 }
  0xc4   :  { %501 = vmatmul.f32.vlgmr.msrb.gmra.mxu1 %v279_v21  ;;  %521 = vmatmul.f32.vlgmr.msrb.gmra.mxu2 %v280_v22  ;;  %v657_v27 = vsub.f32 1.0, %v656_v15 }
  0xc5   :  { %577 = vmatpush.xpose.msra.mxu1 %v168_v8  ;;  %597 = vmatpush.xpose.msra.mxu2 %v169_v9  ;;  %v633_v8 = vunpack.c.l.s4 %v883_v7 }
  0xc7   :  { %538 = vmatpush.xpose.msrb.mxu3 %v158_v13  ;;  %558 = vmatpush.xpose.msra.mxu0 %v159_v14  ;;  %v634_v21 = vunpack.c.0.s8 %v633_v8 }
  0xc9   :  { %578 = vmatpush.xpose.msra.mxu1 %v166_v17  ;;  %598 = vmatpush.xpose.msra.mxu2 %v167_v18 }
  0xcb   :  { %539 = vmatpush.xpose.msrb.mxu3 %v156_v25  ;;  %559 = vmatpush.xpose.msra.mxu0 %v157_v26 }
  0xcd   :  { %579 = vmatpush.xpose.msra.mxu1 %v164_v29  ;;  %599 = vmatpush.xpose.msra.mxu2 %v165_v30 }
  0xcf   :  { %540 = vmatpush.xpose.msrb.mxu3 %v154_v32  ;;  %560 = vmatpush.xpose.msra.mxu0 %v155_v23  ;;  %v658_v23 = vmul.f32 %v870_v4, %v657_v27 }
  0xd1   :  { %580 = vmatpush.xpose.msra.mxu1 %v162_v34  ;;  %600 = vmatpush.xpose.msra.mxu2 %v163_v35  ;;  %v659_v37 = vadd.f32 %v870_v4, %v658_v23 }
  0xd2   :  { %541 = vmatmul.f32.vlgmr.msrb.gmra.mxu3 %v281_v38  ;;  %561 = vmatmul.f32.vlgmr.msra.gmra.mxu0 %v282_v39  ;;  %v664_v38 = vand.u32 2147483647, %v1243_v42 }
  0xd4   :  { %581 = vmatmul.f32.vlgmr.msra.gmra.mxu1 %v283_v40  ;;  %601 = vmatmul.f32.vlgmr.msra.gmra.mxu2 %v284_v41  ;;  %v667_v40 = vor.u32 1.1754944e-38, %v666_v36  ;;  %v663_v41 = vsel %vm662_vm6, %v870_v4, %v659_v37  ;;  %vm665_vm7 = vcmp.eq.f32.partialorder %v664_v38, 8.507059e+37  ;;  %v788_v36 = vld [vmem:[%s1352_s3 + $0x70] sm:$0xff]  ;;  %v787_v37 = vld [vmem:[%s1352_s3 + $0x68] sm:$0xff]  ;;  %v786_v38 = vld [vmem:[%s1352_s3 + $0x60] sm:$0xff] }
 0x12f   :  { %v322_v43 = vpop.f32.mrf.mxu0 }
 0x131   :  { %v342_v45 = vpop.f32.mrf.mxu1 }
 0x135   :  { %v302_v44 = vpop.f32.mrf.mxu3 }
 0x136   :  { %v323_v1 = vadd.f32 %v322_v43, %v302_v44  ;;  %v668_v43 = vsel %vm665_vm7, %v667_v40, %v663_v41 }
 0x137   :  { %v362_v46 = vpop.f32.mrf.mxu2  ;;  %v402_v47 = vpop.f32.mrf.mxu0 }
 0x138   :  { %v363_v57 = vadd.f32 %v362_v46, %v342_v45  ;;  %v1259_v45 = vand.u32 127, %v208_v11 }
 0x139   :  { %v422_v49 = vpop.f32.mrf.mxu1 }
 0x13a   :  { %vm654_vm9 = vcmp.lt.s32.totalorder %v1259_v45, 32  ;;  %vm815_vm2 = vcmp.ge.s32.totalorder %v1259_v45, 6 }
 0x13d   :  { %v382_v48 = vpop.f32.mrf.mxu3 }
 0x13e   :  { %v403_v58 = vadd.f32 %v402_v47, %v382_v48 }
 0x13f   :  { %v442_v50 = vpop.f32.mrf.mxu2  ;;  %v482_v20 = vpop.f32.mrf.mxu0 }
 0x140   :  { %v443_v52 = vadd.f32 %v442_v50, %v422_v49  ;;  %v605_v63 = vrot.slane %v403_v58, 4  ;;  %v885_v50 = vmov 64.0  }
 0x141   :  { %v502_v59 = vpop.f32.mrf.mxu1  ;;  %871 = vrcp.f32 %v885_v50 }
 0x142   :  { %v612_v53 = vrot.slane %v443_v52, 4  ;;  %v607_v5 = vsel %vm606_vm3, %v605_v63, %v323_v1  ;;  %v710_v63 = vld [vmem:[%s1352_s3 + $0x20] sm:$0xff]  ;;  %v708_v1 = vld [vmem:[%s1352_s3 + $0x10] sm:$0xff] }
 0x143   :  { %v611_v16 = vperm.slane %v607_v5, %v610_v62 }
 0x144   :  { %v613_v61 = vsel %vm606_vm3, %v612_v53, %v363_v57 }
 0x145   :  { %v462_v56 = vpop.f32.mrf.mxu3  ;;  %v617_v0 = vperm.slane %v613_v61, %v610_v62  ;;  %v712_v61 = vld [vmem:[%s1352_s3 + $0x30] sm:$0xff] }
 0x146   :  { %v483_v17 = vadd.f32 %v482_v20, %v462_v56 }
 0x147   :  { %v522_v60 = vpop.f32.mrf.mxu2  ;;  %v630_v9 = vrot.slane %v617_v0, 4  ;;  %v872_v51 = vpop.eup %871  ;;  %v709_v0 = vld [vmem:[%s1352_s3 + $0x18] sm:$0xff] }
 0x148   :  { %v523_v18 = vadd.f32 %v522_v60, %v502_v59  ;;  %v681_v52 = vmul.f32 64.0, %v872_v51  ;;  %vm685_vm10 = vweird.f32 %v872_v51  ;;  %v713_v60 = vld [vmem:[%s1352_s3 + $0x38] sm:$0xff] }
 0x149   :  { %v631_v22 = vsel %vm606_vm3, %v630_v9, %v611_v16  ;;  %727 = vmatpush.msra.mxu3 %v713_v60  ;;  %v857_v16 = vld [vmem:[%s1352_s3 + $0x80] ss:$0 sm:$0xff] }
 0x14a   :  { %v635_v29 = vperm.slane %v631_v22, %v634_v21  ;;  %v682_v53 = vsub.f32 1.0, %v681_v52 }
 0x14b   :  { %728 = vmatpush.msra.mxu3 %v712_v61  ;;  %v860_v61 = vld [vmem:[%s1352_s3 + $0x81] ss:$0 sm:$0xff] }
 0x14c   :  { %v644_v33 = vrot.slane %v635_v29, 4  ;;  %v683_v54 = vmul.f32 %v872_v51, %v682_v53 }
 0x14e   :  { %v684_v11 = vadd.f32 %v872_v51, %v683_v54 }
 0x14f   :  { %v562_v2 = vpop.f32.mrf.mxu0 }
 0x150   :  { %v686_v55 = vsel %vm685_vm10, %v872_v51, %v684_v11 }
 0x151   :  { %v582_v10 = vpop.f32.mrf.mxu1 }
 0x155   :  { %v542_v3 = vpop.f32.mrf.mxu3 }
 0x156   :  { %v563_v6 = vadd.f32 %v562_v2, %v542_v3  ;;  %v707_v2 = vld [vmem:[%s1352_s3 + $0x8] sm:$0xff]  ;;  %v706_v3 = vld [vmem:[%s1352_s3] sm:$0xff] }
 0x157   :  { %v602_v12 = vpop.f32.mrf.mxu2 }
 0x158   :  { %v618_v13 = vrot.slane %v563_v6, 4  ;;  %v603_v14 = vadd.f32 %v602_v12, %v582_v10 }
 0x15a   :  { %v624_v19 = vrot.slane %v603_v14, 4  ;;  %v619_v25 = vsel %vm606_vm3, %v618_v13, %v483_v17 }
 0x15b   :  { %v623_v30 = vperm.slane %v619_v25, %v610_v62 }
 0x15c   :  { %v625_v26 = vsel %vm606_vm3, %v624_v19, %v523_v18 }
 0x15d   :  { %v629_v28 = vperm.slane %v625_v26, %v610_v62  ;;  %v711_v62 = vld [vmem:[%s1352_s3 + $0x28] sm:$0xff] }
 0x15e   :  { %729 = vmatpush.msra.mxu3 %v711_v62 }
 0x15f   :  { %v636_v31 = vrot.slane %v629_v28, 4 }
 0x160   :  { %730 = vmatpush.msra.mxu3 %v710_v63 }
 0x161   :  { %v637_v32 = vsel %vm606_vm3, %v636_v31, %v623_v30 }
 0x162   :  { %v641_v24 = vperm.slane %v637_v32, %v634_v21  ;;  %731 = vmatpush.msra.mxu3 %v709_v0 }
 0x164   :  { %v642_v34 = vrot.slane %v641_v24, 4  ;;  %v645_v35 = vsel %vm606_vm3, %v641_v24, %v644_v33  ;;  %732 = vmatpush.msra.mxu3 %v708_v1 }
 0x165   :  { %647 = vrot.lane.b32.xlu0 %v645_v35, %s884_s2  ;;  %v789_v35 = vld [vmem:[%s1352_s3 + $0x78] sm:$0xff] }
 0x166   :  { %v643_v39 = vsel %vm606_vm3, %v642_v34, %v635_v29  ;;  %733 = vmatpush.msra.mxu3 %v707_v2  ;;  %803 = vmatpush.msrb.mxu0 %v789_v35  ;;  %vm816_vm3 = vcmp.lt.s32.totalorder %v1259_v45, 9 }
 0x167   :  { %vm817_vm4 = vmand %vm815_vm2, %vm816_vm3 }
 0x168   :  { %734 = vmatpush.msra.mxu3 %v706_v3  ;;  %804 = vmatpush.msrb.mxu0 %v788_v36 }
 0x16a   :  { %805 = vmatpush.msrb.mxu0 %v787_v37 }
 0x16c   :  { %806 = vmatpush.msrb.mxu0 %v786_v38 }
 0x16d   :  { %672 = vperm.xlu0 %856, %v668_v43   ;;  %v784_v43 = vld [vmem:[%s1352_s3 + $0x50] sm:$0xff] }
 0x1d7   :  { %v648_v44 = vpop.permute.xlu0 %647 }
 0x1d8   :  { %v651_v47 = vsel %vm650_vm8, %v643_v39, %v648_v44  ;;  %v785_v39 = vld [vmem:[%s1352_s3 + $0x58] sm:$0xff] }
 0x1d9   :  { %807 = vmatpush.msrb.mxu0 %v785_v39 }
 0x1db   :  { %808 = vmatpush.msrb.mxu0 %v784_v43 }
 0x1df   :  { %v673_v46 = vpop.permute.xlu0 %672 }
 0x1e0   :  { %v675_v48 = vmul.f32 %v673_v46, %v651_v47 }
 0x1e2   :  { %v676_v42 = vsel %vm654_vm9, %v675_v48, %v651_v47  ;;  %v783_v47 = vld [vmem:[%s1352_s3 + $0x48] sm:$0xff] }
 0x1e3   :  { %v677_v49 = vsel %vm42_vm0, %v676_v42, 0.0  ;;  %809 = vmatpush.msrb.mxu0 %v783_v47 }
 0x1e4   :  { %678 = vadd.xlane.f32.xlu1 %v677_v49  ;;  %v782_v49 = vld [vmem:[%s1352_s3 + $0x40] sm:$0xff] }
 0x1e5   :  { %810 = vmatpush.msrb.mxu0 %v782_v49 }
 0x257   :  { %v679_v20 = vpop.xlane.xlu1 %678 }
 0x258   :  { %v687_v56 = vmul.f32 %v686_v55, %v679_v20 }
 0x25a   :  { %v688_v57 = vsub.f32 %v676_v42, %v687_v56 }
 0x25c   :  { %v689_v58 = vmul.f32 %v688_v57, %v688_v57 }
 0x25e   :  { %v690_v59 = vsel %vm42_vm0, %v689_v58, 0.0 }
 0x25f   :  { %691 = vadd.xlane.f32.xlu1 %v690_v59 }
 0x2d2   :  { %v692_v4 = vpop.xlane.xlu1 %691 }
 0x2d3   :  { %v693_v5 = vmul.f32 %v692_v4, %v686_v55  ;;  %v858_v55 = vld [vmem:[%s1352_s3 + $0x82] ss:$0 sm:$0xff] }
 0x2d5   :  { %v694_v6 = vadd.f32 1e-05, %v693_v5 }
 0x2d7   :  { %873 = vrsqrt.f32 %v694_v6  ;;  %vm701_vm12 = vweird.f32 %v694_v6 }
 0x2dd   :  { %v874_v7 = vpop.eup %873 }
 0x2de   :  { %v696_v8 = vmul.f32 %v874_v7, %v694_v6  ;;  %vm702_vm11 = vweird.f32 %v874_v7 }
 0x2df   :  { %vm703_vm13 = vmor %vm701_vm12, %vm702_vm11 }
 0x2e0   :  { %v697_v9 = vmul.f32 %v874_v7, %v696_v8 }
 0x2e2   :  { %v698_v10 = vmul.f32 0.5, %v697_v9 }
 0x2e4   :  { %v699_v12 = vsub.f32 1.5, %v698_v10 }
 0x2e6   :  { %v700_v13 = vmul.f32 %v874_v7, %v699_v12 }
 0x2e8   :  { %v704_v14 = vsel %vm703_vm13, %v874_v7, %v700_v13 }
 0x2e9   :  { %v705_v15 = vmul.f32 %v704_v14, %v688_v57  ;;  %v859_v57 = vld [vmem:[%s1352_s3 + $0x83] ss:$0 sm:$0xff] }
 0x2eb   :  { %848 = vmatmul.msk.f32.vlgmr.msra.gmra.mxu3 %vm42_vm0, %v705_v15 }
 0x36e   :  { %v736_v17 = vpop.f32.mrf.mxu3 }
 0x36f   :  { %v737_v18 = vadd.f32 %v857_v16, %v736_v17 }
 0x371   :  { %v741_v19 = vsel %vm654_vm9, %v737_v18, 0.0  ;;  %v746_v22 = vsel %vm654_vm9, 0.0, %v737_v18 }
 0x372   :  { %v742_v21 = vsel %vm42_vm0, %v741_v19, 0.0  ;;  %v747_v25 = vsel %vm42_vm0, %v746_v22, 0.0 }
 0x373   :  { %743 = vadd.xlane.f32.xlu2 %v742_v21 }
 0x37b   :  { %748 = vadd.xlane.f32.xlu2 %v747_v25 }
 0x3e6   :  { %v744_v26 = vpop.xlane.xlu2 %743 }
 0x3e7   :  { %v745_v28 = vmul.f32 0.03125, %v744_v26 }
 0x3ee   :  { %v749_v27 = vpop.xlane.xlu2 %748 }
 0x3ef   :  { %v750_v29 = vmul.f32 0.03125, %v749_v27 }
 0x3f1   :  { %v751_v30 = vsel %vm654_vm9, %v745_v28, %v750_v29 }
 0x3f2   :  { %v752_v31 = vsub.f32 %v737_v18, %v751_v30 }
 0x3f4   :  { %v753_v32 = vmul.f32 %v752_v31, %v752_v31 }
 0x3f6   :  { %v759_v23 = vsel %vm654_vm9, 0.0, %v753_v32  ;;  %v754_v24 = vsel %vm654_vm9, %v753_v32, 0.0 }
 0x3f7   :  { %v760_v33 = vsel %vm42_vm0, %v759_v23, 0.0  ;;  %v755_v34 = vsel %vm42_vm0, %v754_v24, 0.0 }
 0x3f8   :  { %761 = vadd.xlane.f32.xlu2 %v760_v33  ;;  %756 = vadd.xlane.f32.xlu1 %v755_v34 }
 0x46b   :  { %v762_v40 = vpop.xlane.xlu2 %761  ;;  %v757_v41 = vpop.xlane.xlu1 %756 }
 0x46c   :  { %v763_v44 = vmul.f32 0.03125, %v762_v40  ;;  %v758_v46 = vmul.f32 0.03125, %v757_v41 }
 0x46e   :  { %v764_v48 = vsel %vm654_vm9, %v758_v46, %v763_v44 }
 0x46f   :  { %v765_v42 = vadd.f32 1e-05, %v764_v48 }
 0x471   :  { %875 = vrsqrt.f32 %v765_v42  ;;  %vm772_vm15 = vweird.f32 %v765_v42 }
 0x477   :  { %v876_v50 = vpop.eup %875 }
 0x478   :  { %v767_v51 = vmul.f32 %v876_v50, %v765_v42  ;;  %vm773_vm14 = vweird.f32 %v876_v50 }
 0x479   :  { %vm774_vm1 = vmor %vm772_vm15, %vm773_vm14 }
 0x47a   :  { %v768_v52 = vmul.f32 %v876_v50, %v767_v51 }
 0x47c   :  { %v769_v53 = vmul.f32 0.5, %v768_v52 }
 0x47e   :  { %v770_v54 = vsub.f32 1.5, %v769_v53 }
 0x480   :  { %v771_v11 = vmul.f32 %v876_v50, %v770_v54 }
 0x482   :  { %v775_v20 = vsel %vm774_vm1, %v876_v50, %v771_v11 }
 0x483   :  { %v776_v56 = vmul.f32 %v775_v20, %v752_v31 }
 0x485   :  { %v778_v58 = vmul.f32 %v858_v55, %v776_v56 }
 0x487   :  { %v780_v59 = vadd.f32 %v859_v57, %v778_v58 }
 0x489   :  { %v781_v60 = vmax.f32 %v780_v59, 0.0 }
 0x48b   :  { %849 = vmatmul.msk.f32.vlgmr.msrb.gmra.mxu0 %vm42_vm0, %v781_v60 }
 0x508   :  { %v812_v62 = vpop.f32.mrf.mxu0 }
 0x509   :  { %v813_v63 = vadd.f32 %v860_v61, %v812_v62 }
 0x50b   :  { %v850_v0 = vmul.f32 -1.442695, %v813_v63 }
 0x50d   :  { %877 = vpow2.f32 %v850_v0 }
 0x513   :  { %v878_v1 = vpop.eup %877 }
 0x514   :  { %v821_v2 = vadd.f32 1.0, %v878_v1 }
 0x516   :  { %879 = vrcp.f32 %v821_v2  ;;  %v833_v6 = vand.u32 2147483648, %v821_v2  ;;  %v831_v8 = vand.u32 2147483647, %v821_v2  ;;  %vm827_vm5 = vweird.f32 %v821_v2 }
 0x518   :  { %v834_v10 = vor.u32 1.1754944e-38, %v833_v6  ;;  %vm832_vm7 = vcmp.eq.f32.partialorder %v831_v8, 8.507059e+37 }
 0x51c   :  { %v880_v3 = vpop.eup %879 }
 0x51d   :  { %v823_v4 = vmul.f32 %v880_v3, %v821_v2  ;;  %vm828_vm0 = vweird.f32 %v880_v3 }
 0x51e   :  { %vm829_vm6 = vmor %vm827_vm5, %vm828_vm0 }
 0x51f   :  { %v824_v5 = vsub.f32 1.0, %v823_v4 }
 0x521   :  { %v825_v7 = vmul.f32 %v880_v3, %v824_v5 }
 0x523   :  { %v826_v9 = vadd.f32 %v880_v3, %v825_v7 }
 0x525   :  { %v830_v12 = vsel %vm829_vm6, %v880_v3, %v826_v9 }
 0x526   :  { %v835_v13 = vsel %vm832_vm7, %v834_v10, %v830_v12 }
 0x527   :  { %v837_v14 = vsel %vm817_vm4, %v835_v13, %v813_v63 }
 0x528   :  { %838 = vst [vmem:[%s1353_s4] sm:$0xff] %v837_v14 }

</bundles_post_ra>
